<compile_context>
chip_gen: v5e
topology: v5e:2x2
jax: 0.10.0
libtpu: 0.0.40
codegen_flags: <defaults>
</compile_context>

<pallas_src>
import functools
import math

import jax
import jax.numpy as jnp
from jax import lax
from jax.experimental import pallas as pl
from jax.experimental.pallas import tpu as pltpu


# ----------------------------------------------------------------------------
# Kernel 1: input_conv (1x1, or 2x2/s2 via space-to-depth columns) + folded-BN
# + PReLU, channel-major:  o[co, s] = prelu(sum_k w[co, k] * x[k, s] + shift)
# ----------------------------------------------------------------------------
def _stage1_kernel(x_ref, w_ref, shift_ref, alpha_ref, o_ref):
    x = x_ref[0].astype(jnp.bfloat16)                      # (K, ts)
    acc = jnp.dot(w_ref[...], x, preferred_element_type=jnp.float32)
    y = acc + shift_ref[...]                               # (+ shift[co])
    a = alpha_ref[0]                                       # PReLU slope (SMEM)
    y = jnp.where(y >= 0.0, y, a * y)
    o_ref[0] = y.astype(o_ref.dtype)


def _pick_lane_tile(s, cap=8192):
    """Largest multiple-of-128 divisor of s that is <= cap, else full extent."""
    if s <= cap or s % 128 != 0:
        return s
    ts = cap - (cap % 128)
    while s % ts != 0:
        ts -= 128
    return ts


def stage1(x_km, w, shift, alpha):
    """x_km: (N, K, S) channel-major activations; w: (Cint, K) bf16 (BN-scale
    folded); shift: (Cint, 1) f32; alpha: (1,) f32."""
    n, k, s = x_km.shape
    cint = w.shape[0]
    ts = _pick_lane_tile(s)
    return pl.pallas_call(
        _stage1_kernel,
        out_shape=jax.ShapeDtypeStruct((n, cint, s), jnp.bfloat16),
        grid=(n, s // ts),
        in_specs=[
            pl.BlockSpec((1, k, ts), lambda i, j: (i, 0, j)),
            pl.BlockSpec((cint, k), lambda i, j: (0, 0)),
            pl.BlockSpec((cint, 1), lambda i, j: (0, 0)),
            pl.BlockSpec(memory_space=pltpu.MemorySpace.SMEM),
        ],
        out_specs=pl.BlockSpec((1, cint, ts), lambda i, j: (i, 0, j)),
        compiler_params=pltpu.CompilerParams(
            dimension_semantics=("parallel", "parallel")),
    )(x_km, w, shift, alpha)


# ----------------------------------------------------------------------------
# Kernel 2: middle 3x3 dilated conv (+bias folded) + BN + PReLU, fused with the
# output 1x1 conv + BN.  The padded activation for one image is a flat
# (Cint, Lpad) bf16 tile; tap (i, j) is the static slice starting at column
# off = i*d*Wp + j*d, so the 3x3 conv is 9 small matmuls into one accumulator.
# Output column q = h*Wp + w (only w < W is valid; the host crops).
# ----------------------------------------------------------------------------
def _stage23_kernel(x_ref, wmid_ref, shift_mid_ref, alpha_ref, wout_ref,
                    shift_out_ref, o_ref, *, d, wp, lq):
    x = x_ref[0]                                           # (Cint, Lpad) bf16
    cint = x.shape[0]
    acc = jnp.zeros((cint, lq), jnp.float32)
    for i in range(3):
        for j in range(3):
            off = i * d * wp + j * d                       # static offset
            acc = acc + jnp.dot(wmid_ref[i * 3 + j],
                                x[:, off:off + lq],
                                preferred_element_type=jnp.float32)
    y = acc + shift_mid_ref[...]                           # BN shift + bias
    a = alpha_ref[0]
    y = jnp.where(y >= 0.0, y, a * y)                      # PReLU
    z = jnp.dot(wout_ref[...], y.astype(jnp.bfloat16),     # fused output 1x1
                preferred_element_type=jnp.float32)
    o_ref[0] = z + shift_out_ref[...]


def stage23(act1p_flat, wmid, shift_mid, alpha, wout, shift_out, *, d, wp, lq):
    n, cint, lpad = act1p_flat.shape
    cout = wout.shape[0]
    kernel = functools.partial(_stage23_kernel, d=d, wp=wp, lq=lq)
    return pl.pallas_call(
        kernel,
        out_shape=jax.ShapeDtypeStruct((n, cout, lq), jnp.float32),
        grid=(n,),
        in_specs=[
            pl.BlockSpec((1, cint, lpad), lambda i: (i, 0, 0)),
            pl.BlockSpec((9, cint, cint), lambda i: (0, 0, 0)),
            pl.BlockSpec((cint, 1), lambda i: (0, 0)),
            pl.BlockSpec(memory_space=pltpu.MemorySpace.SMEM),
            pl.BlockSpec((cout, cint), lambda i: (0, 0)),
            pl.BlockSpec((cout, 1), lambda i: (0, 0)),
        ],
        out_specs=pl.BlockSpec((1, cout, lq), lambda i: (i, 0, 0)),
        compiler_params=pltpu.CompilerParams(
            dimension_semantics=("parallel",)),
    )(act1p_flat, wmid, shift_mid, alpha, wout, shift_out)


# ----------------------------------------------------------------------------
# Parameter construction (deterministic synthetic weights; BN folded for eval)
# ----------------------------------------------------------------------------
def _init_conv_w(key, cout, cin, kh, kw):
    fan = cin * kh * kw
    return jax.random.normal(key, (cout, cin, kh, kw), jnp.float32) / math.sqrt(fan)


def _bn_affine(c, eps=1e-3):
    # Fresh nn.BatchNorm2d in eval mode: gamma=1, beta=0, running mean=0, var=1.
    gamma = jnp.ones((c,), jnp.float32)
    beta = jnp.zeros((c,), jnp.float32)
    mean = jnp.zeros((c,), jnp.float32)
    var = jnp.ones((c,), jnp.float32)
    scale = gamma / jnp.sqrt(var + eps)
    shift = beta - mean * scale
    return scale, shift


def init_main_path_params(key, *, internal_scale, input_channels,
                          output_channels, downsample, dilated):
    internal = output_channels // internal_scale
    ks = 2 if downsample else 1
    k1, k2, k3, k4 = jax.random.split(key, 4)

    w_in = _init_conv_w(k1, internal, input_channels, ks, ks)       # OIHW
    w_mid = _init_conv_w(k2, internal, internal, 3, 3)
    b_mid = jax.random.normal(k3, (internal,), jnp.float32) * 0.01
    w_out = _init_conv_w(k4, output_channels, internal, 1, 1)

    s_in, sh_in = _bn_affine(internal)
    s_mid, sh_mid = _bn_affine(internal)
    s_out, sh_out = _bn_affine(output_channels)

    # Stage 1: channel-major matmul weight (Cint, ks*ks*Cin), tap-major /
    # channel-minor columns; BN scale folded into the bf16 weight rows.
    wg = w_in.transpose(0, 2, 3, 1).reshape(internal, ks * ks * input_channels)
    wg = (wg * s_in[:, None]).astype(jnp.bfloat16)
    shift1 = sh_in.reshape(internal, 1)

    # Stage 2: one (Cint, Cint) weight per 3x3 tap (t = i*3 + j), scale folded.
    wm = w_mid.transpose(2, 3, 0, 1).reshape(9, internal, internal)
    wm = (wm * s_mid[None, :, None]).astype(jnp.bfloat16)
    shift2 = (sh_mid + b_mid * s_mid).reshape(internal, 1)   # conv bias folded

    # Stage 3: (Cout, Cint) weight, scale folded; BN shift only.
    wo = w_out.reshape(output_channels, internal)
    wo = (wo * s_out[:, None]).astype(jnp.bfloat16)
    shift3 = sh_out.reshape(output_channels, 1)

    params = dict(
        w1=wg, shift1=shift1, alpha1=jnp.full((1,), 0.25, jnp.float32),
        w2=wm, shift2=shift2, alpha2=jnp.full((1,), 0.25, jnp.float32),
        w3=wo, shift3=shift3,
    )
    raw = dict(w_in=w_in, w_mid=w_mid, b_mid=b_mid, w_out=w_out)
    return params, raw


# ----------------------------------------------------------------------------
# EnetEncoderMainPath forward (NCHW f32 in -> NCHW f32 out)
# ----------------------------------------------------------------------------
@functools.partial(jax.jit, static_argnames=("downsample", "dilated"))
def enet_encoder_main_path(params, x_nchw, *, downsample, dilated):
    d = int(dilated) if dilated else 1
    n, c, h, w = x_nchw.shape

    # --- input_conv + BN + PReLU (kernel 1) --------------------------------
    if downsample:
        # k=2, s=2 conv == space-to-depth (floor on odd dims, like PyTorch).
        ho, wo = h // 2, w // 2
        xb = x_nchw[:, :, :2 * ho, :2 * wo].astype(jnp.bfloat16)
        taps = [xb[:, :, di::2, dj::2] for di in (0, 1) for dj in (0, 1)]
        x_km = jnp.concatenate(taps, axis=1).reshape(n, 4 * c, ho * wo)
    else:
        # 1x1 conv: NCHW is already channel-major — free view, no transpose.
        ho, wo = h, w
        x_km = x_nchw.reshape(n, c, h * w)
    act1 = stage1(x_km, params['w1'], params['shift1'], params['alpha1'])
    cint = act1.shape[1]

    # --- middle 3x3 (dilation d) + BN + PReLU, fused with output 1x1 + BN ---
    hp, wp = ho + 2 * d, wo + 2 * d
    lq = ho * wp                                   # computed output columns
    # Zero-pad spatially; the extra (d+1) bottom rows keep all 9 shifted
    # slices of the flattened tile in bounds.  Then flatten to (N, Cint, Lpad).
    act1p = jnp.pad(act1.reshape(n, cint, ho, wo),
                    ((0, 0), (0, 0), (d, d + 1), (d, d)))
    act1p = act1p.reshape(n, cint, (hp + 1) * wp)
    out = stage23(act1p, params['w2'], params['shift2'], params['alpha2'],
                  params['w3'], params['shift3'], d=d, wp=wp, lq=lq)

    # TODO(synk): nn.Dropout2d is stochastic in train mode; applied here as the
    # eval-mode identity.
    cout = out.shape[1]
    # Output is already channel-major (NCHW); only crop the W padding.
    return out.reshape(n, cout, ho, wp)[:, :, :, :wo]


# ----------------------------------------------------------------------------
# Pure-JAX reference (f32) for correctness checking
# ----------------------------------------------------------------------------
def reference_forward(raw, x, *, downsample, dilated):
    d = int(dilated) if dilated else 1
    s = 2 if downsample else 1
    dn = ('NCHW', 'OIHW', 'NCHW')

    def bn(y, eps=1e-3):
        return y / jnp.sqrt(1.0 + eps)     # gamma=1, beta=0, mean=0, var=1

    def prelu(y, a=0.25):
        return jnp.where(y >= 0.0, y, a * y)

    y = lax.conv_general_dilated(x, raw['w_in'], (s, s), 'VALID',
                                 dimension_numbers=dn)
    y = prelu(bn(y))
    y = lax.conv_general_dilated(y, raw['w_mid'], (1, 1), [(d, d), (d, d)],
                                 rhs_dilation=(d, d), dimension_numbers=dn)
    y = y + raw['b_mid'][None, :, None, None]
    y = prelu(bn(y))
    y = lax.conv_general_dilated(y, raw['w_out'], (1, 1), 'VALID',
                                 dimension_numbers=dn)
    return bn(y)


# ----------------------------------------------------------------------------
# Main
# ----------------------------------------------------------------------------
if __name__ == "__main__":
    root = jax.random.PRNGKey(0)
    kp1, kp2, kx1, kx2 = jax.random.split(root, 4)

    # Config 1: downsampling main path (2x2/s2 input conv).
    p1, raw1 = init_main_path_params(kp1, internal_scale=4, input_channels=16,
                                     output_channels=64, downsample=True,
                                     dilated=False)
    x1 = jax.random.normal(kx1, (2, 16, 16, 16), jnp.float32)
    y1 = jax.block_until_ready(
        enet_encoder_main_path(p1, x1, downsample=True, dilated=False))
    assert y1.shape == (2, 64, 8, 8), y1.shape
    r1 = reference_forward(raw1, x1, downsample=True, dilated=False)
    err1 = float(jnp.linalg.norm(y1 - r1) / (jnp.linalg.norm(r1) + 1e-6))
    assert math.isfinite(err1) and err1 < 0.05, err1   # bf16-level tolerance

    # Config 2: non-downsampling, dilated (d=2) main path (1x1 input conv).
    p2, raw2 = init_main_path_params(kp2, internal_scale=4, input_channels=64,
                                     output_channels=64, downsample=False,
                                     dilated=2)
    x2 = jax.random.normal(kx2, (2, 64, 16, 16), jnp.float32)
    y2 = jax.block_until_ready(
        enet_encoder_main_path(p2, x2, downsample=False, dilated=2))
    assert y2.shape == (2, 64, 16, 16), y2.shape
    r2 = reference_forward(raw2, x2, downsample=False, dilated=2)
    err2 = float(jnp.linalg.norm(y2 - r2) / (jnp.linalg.norm(r2) + 1e-6))
    assert math.isfinite(err2) and err2 < 0.05, err2

    print("KERNEL_OK")
</pallas_src>

<mosaic_0001>
module attributes {stable_mosaic.version = 11 : i64} {
  func.func @_stage1_kernel(%arg0: i32, %arg1: i32, %arg2: memref<1x64x64xbf16, #tpu.memory_space<vmem>>, %arg3: memref<16x64xbf16, #tpu.memory_space<vmem>>, %arg4: memref<16x1xf32, #tpu.memory_space<vmem>>, %arg5: memref<1xf32, #tpu.memory_space<smem>>, %arg6: memref<1x16x64xbf16, #tpu.memory_space<vmem>>) attributes {dimension_semantics = [#tpu.dimension_semantics<parallel>, #tpu.dimension_semantics<parallel>], iteration_bounds = array<i64: 2, 1>, scalar_prefetch = 0 : i64, scratch_operands = 0 : i64, tpu.core_type = #tpu.core_type<tc>, window_params = [{transform_indices = @transform_0, window_bounds = array<i64: 1, 64, 64>}, {pipeline_mode = #tpu.pipeline_mode<synchronous>, transform_indices = @transform_1, window_bounds = array<i64: 16, 64>}, {pipeline_mode = #tpu.pipeline_mode<synchronous>, transform_indices = @transform_2, window_bounds = array<i64: 16, 1>}, {transform_indices = @transform_3, window_bounds = array<i64: 1>}, {transform_indices = @transform_4, window_bounds = array<i64: 1, 16, 64>}]} {
    %c0 = arith.constant 0 : index
    %c0_0 = arith.constant 0 : index
    %c0_1 = arith.constant 0 : index
    %0 = vector.load %arg2[%c0, %c0_0, %c0_1] : memref<1x64x64xbf16, #tpu.memory_space<vmem>>, vector<1x64x64xbf16>
    %1 = vector.shape_cast %0 : vector<1x64x64xbf16> to vector<64x64xbf16>
    %c0_2 = arith.constant 0 : index
    %c0_3 = arith.constant 0 : index
    %2 = vector.load %arg3[%c0_2, %c0_3] : memref<16x64xbf16, #tpu.memory_space<vmem>>, vector<16x64xbf16>
    %cst = arith.constant dense<0.000000e+00> : vector<16x64xf32>
    %3 = tpu.matmul %2, %1, %cst {dimension_numbers = #tpu.dot_dimension_numbers<[1], [0], [0], [1], [0, 0, 1, 1], [], []>} : vector<16x64xbf16>, vector<64x64xbf16>, vector<16x64xf32> -> vector<16x64xf32>
    %c0_4 = arith.constant 0 : index
    %c0_5 = arith.constant 0 : index
    %4 = vector.load %arg4[%c0_4, %c0_5] : memref<16x1xf32, #tpu.memory_space<vmem>>, vector<16x1xf32>
    %5 = vector.broadcast %4 : vector<16x1xf32> to vector<16x64xf32>
    %6 = arith.addf %3, %5 : vector<16x64xf32>
    %c0_6 = arith.constant 0 : index
    %7 = memref.load %arg5[%c0_6] : memref<1xf32, #tpu.memory_space<smem>>
    %cst_7 = arith.constant 0.000000e+00 : f32
    %8 = vector.broadcast %cst_7 : f32 to vector<16x64xf32>
    %9 = arith.cmpf oge, %6, %8 : vector<16x64xf32>
    %10 = vector.broadcast %7 : f32 to vector<16x64xf32>
    %11 = arith.mulf %10, %6 : vector<16x64xf32>
    %12 = arith.select %9, %6, %11 : vector<16x64xi1>, vector<16x64xf32>
    %13 = arith.truncf %12 : vector<16x64xf32> to vector<16x64xbf16>
    %c0_8 = arith.constant 0 : index
    %c0_9 = arith.constant 0 : index
    %c0_10 = arith.constant 0 : index
    %14 = vector.load %arg6[%c0_8, %c0_9, %c0_10] : memref<1x16x64xbf16, #tpu.memory_space<vmem>>, vector<1x16x64xbf16>
    %15 = vector.shape_cast %14 : vector<1x16x64xbf16> to vector<16x64xbf16>
    %16 = vector.shape_cast %13 : vector<16x64xbf16> to vector<1x16x64xbf16>
    tpu.vector_store %arg6[%c0_8, %c0_9, %c0_10], %16 {strides = array<i32>} : memref<1x16x64xbf16, #tpu.memory_space<vmem>>, vector<1x16x64xbf16>,
    return
  }
  func.func @transform_0(%arg0: i32, %arg1: i32) -> (i32, i32, i32) {
    %c0_i32 = arith.constant 0 : i32
    %c0_i32_0 = arith.constant 0 : i32
    return %arg0, %c0_i32, %arg1 : i32, i32, i32
  }
  func.func @transform_1(%arg0: i32, %arg1: i32) -> (i32, i32) {
    %c0_i32 = arith.constant 0 : i32
    %c0_i32_0 = arith.constant 0 : i32
    %c0_i32_1 = arith.constant 0 : i32
    return %c0_i32, %c0_i32_0 : i32, i32
  }
  func.func @transform_2(%arg0: i32, %arg1: i32) -> (i32, i32) {
    %c0_i32 = arith.constant 0 : i32
    %c0_i32_0 = arith.constant 0 : i32
    %c0_i32_1 = arith.constant 0 : i32
    return %c0_i32, %c0_i32_0 : i32, i32
  }
  func.func @transform_3(%arg0: i32, %arg1: i32) -> i32 {
    %c0_i32 = arith.constant 0 : i32
    %c0_i32_0 = arith.constant 0 : i32
    return %c0_i32 : i32
  }
  func.func @transform_4(%arg0: i32, %arg1: i32) -> (i32, i32, i32) {
    %c0_i32 = arith.constant 0 : i32
    %c0_i32_0 = arith.constant 0 : i32
    return %arg0, %c0_i32, %arg1 : i32, i32, i32
  }
}

module attributes {stable_mosaic.version = 11 : i64} {
  func.func @_stage23_kernel(%arg0: i32, %arg1: memref<1x16x110xbf16, #tpu.memory_space<vmem>>, %arg2: memref<9x16x16xbf16, #tpu.memory_space<vmem>>, %arg3: memref<16x1xf32, #tpu.memory_space<vmem>>, %arg4: memref<1xf32, #tpu.memory_space<smem>>, %arg5: memref<64x16xbf16, #tpu.memory_space<vmem>>, %arg6: memref<64x1xf32, #tpu.memory_space<vmem>>, %arg7: memref<1x64x80xf32, #tpu.memory_space<vmem>>) attributes {dimension_semantics = [#tpu.dimension_semantics<parallel>], iteration_bounds = array<i64: 2>, scalar_prefetch = 0 : i64, scratch_operands = 0 : i64, tpu.core_type = #tpu.core_type<tc>, window_params = [{transform_indices = @transform_0, window_bounds = array<i64: 1, 16, 110>}, {pipeline_mode = #tpu.pipeline_mode<synchronous>, transform_indices = @transform_1, window_bounds = array<i64: 9, 16, 16>}, {pipeline_mode = #tpu.pipeline_mode<synchronous>, transform_indices = @transform_2, window_bounds = array<i64: 16, 1>}, {transform_indices = @transform_3, window_bounds = array<i64: 1>}, {pipeline_mode = #tpu.pipeline_mode<synchronous>, transform_indices = @transform_4, window_bounds = array<i64: 64, 16>}, {pipeline_mode = #tpu.pipeline_mode<synchronous>, transform_indices = @transform_5, window_bounds = array<i64: 64, 1>}, {transform_indices = @transform_6, window_bounds = array<i64: 1, 64, 80>}]} {
    %c0 = arith.constant 0 : index
    %c0_0 = arith.constant 0 : index
    %c0_1 = arith.constant 0 : index
    %0 = vector.load %arg1[%c0, %c0_0, %c0_1] : memref<1x16x110xbf16, #tpu.memory_space<vmem>>, vector<1x16x110xbf16>
    %1 = vector.shape_cast %0 : vector<1x16x110xbf16> to vector<16x110xbf16>
    %cst = arith.constant 0.000000e+00 : f32
    %2 = vector.broadcast %cst : f32 to vector<16x80xf32>
    %c0_2 = arith.constant 0 : index
    %c0_3 = arith.constant 0 : index
    %c0_4 = arith.constant 0 : index
    %3 = vector.load %arg2[%c0_2, %c0_3, %c0_4] : memref<9x16x16xbf16, #tpu.memory_space<vmem>>, vector<1x16x16xbf16>
    %4 = vector.shape_cast %3 : vector<1x16x16xbf16> to vector<16x16xbf16>
    %5 = vector.extract_strided_slice %1 {offsets = [0, 0], sizes = [16, 80], strides = [1, 1]} : vector<16x110xbf16> to vector<16x80xbf16>
    %cst_5 = arith.constant dense<0.000000e+00> : vector<16x80xf32>
    %6 = tpu.matmul %4, %5, %cst_5 {dimension_numbers = #tpu.dot_dimension_numbers<[1], [0], [0], [1], [0, 0, 1, 1], [], []>} : vector<16x16xbf16>, vector<16x80xbf16>, vector<16x80xf32> -> vector<16x80xf32>
    %7 = arith.addf %2, %6 : vector<16x80xf32>
    %c1 = arith.constant 1 : index
    %c0_6 = arith.constant 0 : index
    %c0_7 = arith.constant 0 : index
    %8 = vector.load %arg2[%c1, %c0_6, %c0_7] : memref<9x16x16xbf16, #tpu.memory_space<vmem>>, vector<1x16x16xbf16>
    %9 = vector.shape_cast %8 : vector<1x16x16xbf16> to vector<16x16xbf16>
    %10 = vector.extract_strided_slice %1 {offsets = [0, 1], sizes = [16, 80], strides = [1, 1]} : vector<16x110xbf16> to vector<16x80xbf16>
    %cst_8 = arith.constant dense<0.000000e+00> : vector<16x80xf32>
    %11 = tpu.matmul %9, %10, %cst_8 {dimension_numbers = #tpu.dot_dimension_numbers<[1], [0], [0], [1], [0, 0, 1, 1], [], []>} : vector<16x16xbf16>, vector<16x80xbf16>, vector<16x80xf32> -> vector<16x80xf32>
    %12 = arith.addf %7, %11 : vector<16x80xf32>
    %c2 = arith.constant 2 : index
    %c0_9 = arith.constant 0 : index
    %c0_10 = arith.constant 0 : index
    %13 = vector.load %arg2[%c2, %c0_9, %c0_10] : memref<9x16x16xbf16, #tpu.memory_space<vmem>>, vector<1x16x16xbf16>
    %14 = vector.shape_cast %13 : vector<1x16x16xbf16> to vector<16x16xbf16>
    %15 = vector.extract_strided_slice %1 {offsets = [0, 2], sizes = [16, 80], strides = [1, 1]} : vector<16x110xbf16> to vector<16x80xbf16>
    %cst_11 = arith.constant dense<0.000000e+00> : vector<16x80xf32>
    %16 = tpu.matmul %14, %15, %cst_11 {dimension_numbers = #tpu.dot_dimension_numbers<[1], [0], [0], [1], [0, 0, 1, 1], [], []>} : vector<16x16xbf16>, vector<16x80xbf16>, vector<16x80xf32> -> vector<16x80xf32>
    %17 = arith.addf %12, %16 : vector<16x80xf32>
    %c3 = arith.constant 3 : index
    %c0_12 = arith.constant 0 : index
    %c0_13 = arith.constant 0 : index
    %18 = vector.load %arg2[%c3, %c0_12, %c0_13] : memref<9x16x16xbf16, #tpu.memory_space<vmem>>, vector<1x16x16xbf16>
    %19 = vector.shape_cast %18 : vector<1x16x16xbf16> to vector<16x16xbf16>
    %20 = vector.extract_strided_slice %1 {offsets = [0, 10], sizes = [16, 80], strides = [1, 1]} : vector<16x110xbf16> to vector<16x80xbf16>
    %cst_14 = arith.constant dense<0.000000e+00> : vector<16x80xf32>
    %21 = tpu.matmul %19, %20, %cst_14 {dimension_numbers = #tpu.dot_dimension_numbers<[1], [0], [0], [1], [0, 0, 1, 1], [], []>} : vector<16x16xbf16>, vector<16x80xbf16>, vector<16x80xf32> -> vector<16x80xf32>
    %22 = arith.addf %17, %21 : vector<16x80xf32>
    %c4 = arith.constant 4 : index
    %c0_15 = arith.constant 0 : index
    %c0_16 = arith.constant 0 : index
    %23 = vector.load %arg2[%c4, %c0_15, %c0_16] : memref<9x16x16xbf16, #tpu.memory_space<vmem>>, vector<1x16x16xbf16>
    %24 = vector.shape_cast %23 : vector<1x16x16xbf16> to vector<16x16xbf16>
    %25 = vector.extract_strided_slice %1 {offsets = [0, 11], sizes = [16, 80], strides = [1, 1]} : vector<16x110xbf16> to vector<16x80xbf16>
    %cst_17 = arith.constant dense<0.000000e+00> : vector<16x80xf32>
    %26 = tpu.matmul %24, %25, %cst_17 {dimension_numbers = #tpu.dot_dimension_numbers<[1], [0], [0], [1], [0, 0, 1, 1], [], []>} : vector<16x16xbf16>, vector<16x80xbf16>, vector<16x80xf32> -> vector<16x80xf32>
    %27 = arith.addf %22, %26 : vector<16x80xf32>
    %c5 = arith.constant 5 : index
    %c0_18 = arith.constant 0 : index
    %c0_19 = arith.constant 0 : index
    %28 = vector.load %arg2[%c5, %c0_18, %c0_19] : memref<9x16x16xbf16, #tpu.memory_space<vmem>>, vector<1x16x16xbf16>
    %29 = vector.shape_cast %28 : vector<1x16x16xbf16> to vector<16x16xbf16>
    %30 = vector.extract_strided_slice %1 {offsets = [0, 12], sizes = [16, 80], strides = [1, 1]} : vector<16x110xbf16> to vector<16x80xbf16>
    %cst_20 = arith.constant dense<0.000000e+00> : vector<16x80xf32>
    %31 = tpu.matmul %29, %30, %cst_20 {dimension_numbers = #tpu.dot_dimension_numbers<[1], [0], [0], [1], [0, 0, 1, 1], [], []>} : vector<16x16xbf16>, vector<16x80xbf16>, vector<16x80xf32> -> vector<16x80xf32>
    %32 = arith.addf %27, %31 : vector<16x80xf32>
    %c6 = arith.constant 6 : index
    %c0_21 = arith.constant 0 : index
    %c0_22 = arith.constant 0 : index
    %33 = vector.load %arg2[%c6, %c0_21, %c0_22] : memref<9x16x16xbf16, #tpu.memory_space<vmem>>, vector<1x16x16xbf16>
    %34 = vector.shape_cast %33 : vector<1x16x16xbf16> to vector<16x16xbf16>
    %35 = vector.extract_strided_slice %1 {offsets = [0, 20], sizes = [16, 80], strides = [1, 1]} : vector<16x110xbf16> to vector<16x80xbf16>
    %cst_23 = arith.constant dense<0.000000e+00> : vector<16x80xf32>
    %36 = tpu.matmul %34, %35, %cst_23 {dimension_numbers = #tpu.dot_dimension_numbers<[1], [0], [0], [1], [0, 0, 1, 1], [], []>} : vector<16x16xbf16>, vector<16x80xbf16>, vector<16x80xf32> -> vector<16x80xf32>
    %37 = arith.addf %32, %36 : vector<16x80xf32>
    %c7 = arith.constant 7 : index
    %c0_24 = arith.constant 0 : index
    %c0_25 = arith.constant 0 : index
    %38 = vector.load %arg2[%c7, %c0_24, %c0_25] : memref<9x16x16xbf16, #tpu.memory_space<vmem>>, vector<1x16x16xbf16>
    %39 = vector.shape_cast %38 : vector<1x16x16xbf16> to vector<16x16xbf16>
    %40 = vector.extract_strided_slice %1 {offsets = [0, 21], sizes = [16, 80], strides = [1, 1]} : vector<16x110xbf16> to vector<16x80xbf16>
    %cst_26 = arith.constant dense<0.000000e+00> : vector<16x80xf32>
    %41 = tpu.matmul %39, %40, %cst_26 {dimension_numbers = #tpu.dot_dimension_numbers<[1], [0], [0], [1], [0, 0, 1, 1], [], []>} : vector<16x16xbf16>, vector<16x80xbf16>, vector<16x80xf32> -> vector<16x80xf32>
    %42 = arith.addf %37, %41 : vector<16x80xf32>
    %c8 = arith.constant 8 : index
    %c0_27 = arith.constant 0 : index
    %c0_28 = arith.constant 0 : index
    %43 = vector.load %arg2[%c8, %c0_27, %c0_28] : memref<9x16x16xbf16, #tpu.memory_space<vmem>>, vector<1x16x16xbf16>
    %44 = vector.shape_cast %43 : vector<1x16x16xbf16> to vector<16x16xbf16>
    %45 = vector.extract_strided_slice %1 {offsets = [0, 22], sizes = [16, 80], strides = [1, 1]} : vector<16x110xbf16> to vector<16x80xbf16>
    %cst_29 = arith.constant dense<0.000000e+00> : vector<16x80xf32>
    %46 = tpu.matmul %44, %45, %cst_29 {dimension_numbers = #tpu.dot_dimension_numbers<[1], [0], [0], [1], [0, 0, 1, 1], [], []>} : vector<16x16xbf16>, vector<16x80xbf16>, vector<16x80xf32> -> vector<16x80xf32>
    %47 = arith.addf %42, %46 : vector<16x80xf32>
    %c0_30 = arith.constant 0 : index
    %c0_31 = arith.constant 0 : index
    %48 = vector.load %arg3[%c0_30, %c0_31] : memref<16x1xf32, #tpu.memory_space<vmem>>, vector<16x1xf32>
    %49 = vector.broadcast %48 : vector<16x1xf32> to vector<16x80xf32>
    %50 = arith.addf %47, %49 : vector<16x80xf32>
    %c0_32 = arith.constant 0 : index
    %51 = memref.load %arg4[%c0_32] : memref<1xf32, #tpu.memory_space<smem>>
    %cst_33 = arith.constant 0.000000e+00 : f32
    %52 = vector.broadcast %cst_33 : f32 to vector<16x80xf32>
    %53 = arith.cmpf oge, %50, %52 : vector<16x80xf32>
    %54 = vector.broadcast %51 : f32 to vector<16x80xf32>
    %55 = arith.mulf %54, %50 : vector<16x80xf32>
    %56 = arith.select %53, %50, %55 : vector<16x80xi1>, vector<16x80xf32>
    %c0_34 = arith.constant 0 : index
    %c0_35 = arith.constant 0 : index
    %57 = vector.load %arg5[%c0_34, %c0_35] : memref<64x16xbf16, #tpu.memory_space<vmem>>, vector<64x16xbf16>
    %58 = arith.truncf %56 : vector<16x80xf32> to vector<16x80xbf16>
    %cst_36 = arith.constant dense<0.000000e+00> : vector<64x80xf32>
    %59 = tpu.matmul %57, %58, %cst_36 {dimension_numbers = #tpu.dot_dimension_numbers<[1], [0], [0], [1], [0, 0, 1, 1], [], []>} : vector<64x16xbf16>, vector<16x80xbf16>, vector<64x80xf32> -> vector<64x80xf32>
    %c0_37 = arith.constant 0 : index
    %c0_38 = arith.constant 0 : index
    %60 = vector.load %arg6[%c0_37, %c0_38] : memref<64x1xf32, #tpu.memory_space<vmem>>, vector<64x1xf32>
    %61 = vector.broadcast %60 : vector<64x1xf32> to vector<64x80xf32>
    %62 = arith.addf %59, %61 : vector<64x80xf32>
    %c0_39 = arith.constant 0 : index
    %c0_40 = arith.constant 0 : index
    %c0_41 = arith.constant 0 : index
    %63 = vector.load %arg7[%c0_39, %c0_40, %c0_41] : memref<1x64x80xf32, #tpu.memory_space<vmem>>, vector<1x64x80xf32>
    %64 = vector.shape_cast %63 : vector<1x64x80xf32> to vector<64x80xf32>
    %65 = vector.shape_cast %62 : vector<64x80xf32> to vector<1x64x80xf32>
    tpu.vector_store %arg7[%c0_39, %c0_40, %c0_41], %65 {strides = array<i32>} : memref<1x64x80xf32, #tpu.memory_space<vmem>>, vector<1x64x80xf32>,
    return
  }
  func.func @transform_0(%arg0: i32) -> (i32, i32, i32) {
    %c0_i32 = arith.constant 0 : i32
    %c0_i32_0 = arith.constant 0 : i32
    %c0_i32_1 = arith.constant 0 : i32
    return %arg0, %c0_i32, %c0_i32_0 : i32, i32, i32
  }
  func.func @transform_1(%arg0: i32) -> (i32, i32, i32) {
    %c0_i32 = arith.constant 0 : i32
    %c0_i32_0 = arith.constant 0 : i32
    %c0_i32_1 = arith.constant 0 : i32
    %c0_i32_2 = arith.constant 0 : i32
    return %c0_i32, %c0_i32_0, %c0_i32_1 : i32, i32, i32
  }
  func.func @transform_2(%arg0: i32) -> (i32, i32) {
    %c0_i32 = arith.constant 0 : i32
    %c0_i32_0 = arith.constant 0 : i32
    %c0_i32_1 = arith.constant 0 : i32
    return %c0_i32, %c0_i32_0 : i32, i32
  }
  func.func @transform_3(%arg0: i32) -> i32 {
    %c0_i32 = arith.constant 0 : i32
    %c0_i32_0 = arith.constant 0 : i32
    return %c0_i32 : i32
  }
  func.func @transform_4(%arg0: i32) -> (i32, i32) {
    %c0_i32 = arith.constant 0 : i32
    %c0_i32_0 = arith.constant 0 : i32
    %c0_i32_1 = arith.constant 0 : i32
    return %c0_i32, %c0_i32_0 : i32, i32
  }
  func.func @transform_5(%arg0: i32) -> (i32, i32) {
    %c0_i32 = arith.constant 0 : i32
    %c0_i32_0 = arith.constant 0 : i32
    %c0_i32_1 = arith.constant 0 : i32
    return %c0_i32, %c0_i32_0 : i32, i32
  }
  func.func @transform_6(%arg0: i32) -> (i32, i32, i32) {
    %c0_i32 = arith.constant 0 : i32
    %c0_i32_0 = arith.constant 0 : i32
    %c0_i32_1 = arith.constant 0 : i32
    return %arg0, %c0_i32, %c0_i32_0 : i32, i32, i32
  }
}

</mosaic_0001>

<bundles_post_ra>
// kernel: enet_encoder_main_path.2
= control target key start
LH: loop header
LB: loop body
LE: loop exit
PB: predicated region body
PF: predicated region fallthrough
CT: control target
= control target key end

     0   :  { %s514_s17 = smov 0   ;;  %s516_s18 = smov 0   ;;  %s556_s0 = inlined_call_operand.vmem [shape: bf16[2,64,64], index: 0, kind: input, shape index: {}]   ;;  %s557_s1 = inlined_call_operand.vmem [shape: bf16[16,64], index: 1, kind: input, shape index: {}]   ;;  %s558_s2 = inlined_call_operand.vmem [shape: f32[16,1], index: 2, kind: input, shape index: {}]   ;;  %s559_s3 = inlined_call_operand.<no memory space> [shape: f32[1], index: 3, kind: input, shape index: {}]   ;;  %s560_s4 = inlined_call_operand.vmem [shape: bf16[2,16,64], index: 4, kind: output, shape index: {}]  }
   0x1   :  { %9 = sst [smem:[#allocation2]] %s559_s3  ;;  %s518_s19 = smov 0  }
   0x2 LB: > { %s27_s3 = sadd.s32 1, %s479_s18  ;;  %p400_p0 = scmp.ge.s32.totalorder %s483_s19, 1  ;;  %s483_s19 = sphi %s518_s19, %s15_s19   ;;  %s479_s18 = sphi %s516_s18, %s562_s18   ;;  %s475_s17 = sphi %s514_s17, %s561_s17  }
   0x3   : > { %p29_p1 = scmp.ge.s32.totalorder %s27_s3, 2  ;;  %p182_p2 = scmp.lt.s32.totalorder %s483_s19, 3 }
   0x5   : > { %s564_s3 = smov (%p29_p1, %s27_s3), 0  ;;  %p183_p3 = pnand %p400_p0, %p182_p2 }
   0x6   : > { %p214_p4 = scmp.lt.s32.totalorder (!%p183_p3), %s475_s17, 1  ;;  %s300_s30 = sld [smem:[#allocation2]] (!%p183_p3) }
   0x7   : > { %186 = sbr.rel (%p183_p3) target bundleno = 173 (0xad), region = 36 }
   0xc   : > { %v241_v0 = vld [vmem:[%s558_s2] sm:$0xff]  ;;  %v485_v1 = vmov 0   ;;  %s566_s17 = smov (!%p214_p4, %s475_s17), 1  ;;  %v242_v3 = vld [vmem:[%s558_s2 + $0x8] sm:$0xff]  ;;  %vm282_vm0 = vcmask 523264   ;;  %v303_v10 = vstv %s300_s30  ;;  %vm310_vm2 = vcmask 519168  }
   0xd   : > { %460 = vset.pattern.permute.xlu0 %v485_v1  ;;  %s428_s22 = sshll.u32 %s566_s17, 5  ;;  %v434_v7 = vld [vmem:[%s557_s1] sm:$0xff]  ;;  %s429_s5 = sshll.u32 %s566_s17, 3 }
   0xe   : > { %245 = vperm.xlu0 %460, %v241_v0   ;;  %s221_s25 = scalar_lea.vmem %s556_s0, %s428_s22  ;;  %s229_s8 = scalar_lea.vmem %s560_s4, %s429_s5 }
   0xf   : > { %v433_v2 = vld [vmem:[%s221_s25 + $0x18] sm:$0xff]  ;;  %v432_v4 = vld [vmem:[%s221_s25 + $0x10] sm:$0xff]  ;;  %v431_v5 = vld [vmem:[%s221_s25 + $0x8] sm:$0xff] }
  0x10   : > { %290 = vmatpush.bf16.msra.mxu0 %v433_v2  ;;  %v430_v6 = vld [vmem:[%s221_s25] sm:$0xff] }
  0x14   : > { %291 = vmatpush.bf16.msra.mxu0 %v432_v4 }
  0x16   : > { %250 = vperm.xlu0 %460, %v242_v3  }
  0x18   : > { %292 = vmatpush.bf16.msra.mxu0 %v431_v5 }
  0x1c   : > { %293 = vmatpush.bf16.msra.mxu0 %v430_v6 }
  0x1f   : > { %425 = vmatmul.msk.bf16.vlgmr.msra.gmra.mxu0 %vm282_vm0, %v434_v7 }
  0x80   : > { %v246_v8 = vpop.permute.xlu0 %245 }
  0x88   : > { %v251_v15 = vpop.permute.xlu0 %250 }
  0x9c   : > { %v295_v9 = vpop.f32.mrf.mxu0 }
  0x9d   : > { %v296_v11 = vadd.f32 %v295_v9, %v246_v8 }
  0x9f   : > { %vm301_vm1 = vcmp.ge.f32.partialorder %v296_v11, 0.0  ;;  %v304_v12 = vmul.f32 %v303_v10, %v296_v11 }
  0xa1   : > { %v306_v13 = vsel %vm301_vm1, %v296_v11, %v304_v12 }
  0xa2   : > { %v308_v14 = vpack.c.bf16 %v306_v13, %v306_v13 }
  0xa4   : > { %311 = vst.msk [vmem:[%s229_s8] sm:$0xf] %vm310_vm2, %v308_v14  ;;  %v297_v16 = vpop.f32.mrf.mxu0 }
  0xa5   : > { %v298_v17 = vadd.f32 %v297_v16, %v251_v15 }
  0xa7   : > { %vm302_vm3 = vcmp.ge.f32.partialorder %v298_v17, 0.0  ;;  %v305_v18 = vmul.f32 %v303_v10, %v298_v17 }
  0xa9   : > { %v307_v19 = vsel %vm302_vm3, %v298_v17, %v305_v18 }
  0xaa   : > { %v309_v20 = vpack.c.bf16 %v307_v19, %v307_v19 }
  0xac   : > { %312 = vst.msk [vmem:[%s229_s8 + $0x4] sm:$0xf] %vm310_vm2, %v309_v20 }
  0xad PF: > { %s15_s19 = sadd.s32 1, %s483_s19   ;;  %s561_s17 = smov %s479_s18 }
  0xae   : > { %p12_p5 = scmp.ge.s32.totalorder %s15_s19, 4   ;;  %s562_s18 = smov %s564_s3 }
  0xb0   :  { %14 = sbr.rel (!%p12_p5) target bundleno = 2 (0x2), region = 66 }

// kernel: enet_encoder_main_path.3
= control target key start
LH: loop header
LB: loop body
LE: loop exit
PB: predicated region body
PF: predicated region fallthrough
CT: control target
= control target key end

     0   :  { %s917_s23 = smov 0   ;;  %s1038_s0 = inlined_call_operand.vmem [shape: bf16[2,16,110], index: 0, kind: input, shape index: {}]   ;;  %s1039_s1 = inlined_call_operand.vmem [shape: bf16[9,16,16], index: 1, kind: input, shape index: {}]   ;;  %s1040_s2 = inlined_call_operand.vmem [shape: f32[16,1], index: 2, kind: input, shape index: {}]   ;;  %s1041_s3 = inlined_call_operand.<no memory space> [shape: f32[1], index: 3, kind: input, shape index: {}]   ;;  %s1042_s4 = inlined_call_operand.vmem [shape: bf16[64,16], index: 4, kind: input, shape index: {}]   ;;  %s1043_s5 = inlined_call_operand.vmem [shape: f32[64,1], index: 5, kind: input, shape index: {}]   ;;  %s1044_s6 = inlined_call_operand.vmem [shape: f32[2,64,80], index: 6, kind: output, shape index: {}]  }
   0x1   :  { %11 = sst [smem:[#allocation2]] %s1041_s3 }
   0x2 LB: > { %s729_s24 = sadd.s32 4294967295, %s868_s23   ;;  %p733_p0 = scmp.ge.s32.totalorder %s868_s23, 1  ;;  %s868_s23 = sphi %s917_s23, %s17_s23  }
   0x3   : > { %p213_p1 = scmp.lt.s32.totalorder %s868_s23, 3 }
   0x5   : > { %p214_p2 = pnand %p733_p0, %p213_p1 }
   0x6   : > { %p243_p3 = scmp.lt.s32.totalorder (!%p214_p2), %s729_s24, 1  ;;  %s870_s28 = smov (!%p214_p2), 127  }
   0x7   : > { %217 = sbr.rel (%p214_p2) target bundleno = 473 (0x1d9), region = 44  ;;  %s871_s29 = smov (!%p214_p2), 118  }
   0x8   : > { %s872_s8 = smov (!%p214_p2), 108   ;;  %s873_s9 = smov (!%p214_p2), 126  }
   0x9   : > { %s874_s10 = smov (!%p214_p2), 117   ;;  %s875_s11 = smov (!%p214_p2), 107  }
   0xa   : > { %s876_s12 = smov (!%p214_p2), 116   ;;  %s877_s13 = smov (!%p214_p2), 106  }
   0xc   : > { %s1046_s24 = smov (!%p243_p3, %s729_s24), 1  ;;  %v828_v1 = vld [vmem:[%s1039_s1] sm:$0xff]  ;;  %vm274_vm0 = vcmask 130048   ;;  %v829_v6 = vld [vmem:[%s1039_s1 + $0x8] sm:$0xff]  ;;  %v831_v7 = vld [vmem:[%s1039_s1 + $0x18] sm:$0xff]  ;;  %v878_v10 = vmov 0  }
   0xd   : > { %s825_s3 = sshll.u32 %s1046_s24, 3  ;;  %v526_v8 = vld [vmem:[%s1040_s2 + $0x8] sm:$0xff]  ;;  %v525_v9 = vld [vmem:[%s1040_s2] sm:$0xff]  ;;  %860 = vset.pattern.permute.xlu0 %v878_v10  ;;  %859 = vset.pattern.permute.xlu2 %v878_v10  ;;  %v830_v12 = vld [vmem:[%s1039_s1 + $0x10] sm:$0xff]  ;;  %vm665_vm3 = vcmask 654336  }
   0xe   : > { %s247_s27 = scalar_lea.vmem %s1038_s0, %s825_s3  ;;  %861 = vset.pattern.permute.xlu1 %v878_v10  ;;  %v560_v14 = vld [vmem:[%s1043_s5 + $0x20] sm:$0xff]  ;;  %v557_v15 = vld [vmem:[%s1043_s5 + $0x8] sm:$0xff]  ;;  %v835_v18 = vld [vmem:[%s1039_s1 + $0x38] sm:$0xff]  ;;  %s539_s3 = sld [smem:[#allocation2]] }
   0xf   : > { %v827_v0 = vld [vmem:[%s247_s27] sm:$0xff]  ;;  %v833_v20 = vld [vmem:[%s1039_s1 + $0x28] sm:$0xff]  ;;  %v563_v21 = vld [vmem:[%s1043_s5 + $0x38] sm:$0xff] }
  0x10   : > { %271 = vrot.lane.b32.xlu0 %v827_v0, %s870_s28  ;;  %353 = vrot.lane.b32.xlu1 %v827_v0, %s871_s29  ;;  %v832_v16 = vld [vmem:[%s1039_s1 + $0x20] sm:$0xff]  ;;  %v559_v22 = vld [vmem:[%s1043_s5 + $0x18] sm:$0xff] }
  0x11   : > { %443 = vrot.lane.b32.xlu2 %v827_v0, %s872_s8  ;;  %308 = vmatpush.bf16.msra.mxu3 %v827_v0  ;;  %v834_v23 = vld [vmem:[%s1039_s1 + $0x30] sm:$0xff]  ;;  %v836_v25 = vld [vmem:[%s1039_s1 + $0x40] sm:$0xff] }
  0x12   : > { %v562_v24 = vld [vmem:[%s1043_s5 + $0x30] sm:$0xff]  ;;  %v556_v39 = vld [vmem:[%s1043_s5] sm:$0xff] }
  0x13   : > { %v558_v57 = vld [vmem:[%s1043_s5 + $0x10] sm:$0xff] }
  0x14   : > { %753 = vmatmul.msk.bf16.vlgmr.msra.gmra.mxu3 %vm274_vm0, %v828_v1  ;;  %v542_v63 = vstv %s539_s3  ;;  %v839_v10 = vld [vmem:[%s1042_s4 + $0x10] sm:$0xff] }
  0x18   : > { %323 = vrot.lane.b32.xlu0 %v827_v0, %s873_s9  ;;  %383 = vrot.lane.b32.xlu1 %v827_v0, %s874_s10 }
  0x19   : > { %473 = vrot.lane.b32.xlu2 %v827_v0, %s875_s11 }
  0x20   : > { %413 = vrot.lane.b32.xlu0 %v827_v0, %s876_s12  ;;  %503 = vrot.lane.b32.xlu1 %v827_v0, %s877_s13  ;;  %s826_s13 = sshll.u32 %s1046_s24, 6 }
  0x21   : > { %529 = vperm.xlu2 %859, %v525_v9   ;;  %v837_v9 = vld [vmem:[%s1042_s4] sm:$0xff]  ;;  %s1017_s16 = scalar_lea.vmem %s1044_s6, %s826_s13 }
  0x28   : > { %534 = vperm.xlu0 %860, %v526_v8   ;;  %566 = vperm.xlu1 %861, %v556_v39  }
  0x29   : > { %571 = vperm.xlu2 %859, %v557_v15  }
  0x30   : > { %586 = vperm.xlu0 %860, %v560_v14   ;;  %576 = vperm.xlu1 %861, %v558_v57  }
  0x31   : > { %581 = vperm.xlu2 %859, %v559_v22  }
  0x38   : > { %601 = vperm.xlu0 %860, %v563_v21  }
  0x39   : > { %596 = vperm.xlu2 %859, %v562_v24  }
  0x6b   : > { %v444_v2 = vpop.permute.xlu2 %443 }
  0x73   : > { %v474_v3 = vpop.permute.xlu2 %473 }
  0x7b   : > { %v530_v58 = vpop.permute.xlu2 %529 }
  0x82   : > { %v272_v4 = vpop.permute.xlu0 %271  ;;  %v354_v5 = vpop.permute.xlu1 %353 }
  0x83   : > { %285 = vmatpush.bf16.msra.mxu0 %v272_v4  ;;  %366 = vmatpush.bf16.msrb.mxu3 %v354_v5  ;;  %v561_v4 = vld [vmem:[%s1043_s5 + $0x28] sm:$0xff] }
  0x84   : > { %591 = vperm.xlu1 %861, %v561_v4  }
  0x86   : > { %748 = vmatmul.msk.bf16.vlgmr.msra.gmra.mxu0 %vm274_vm0, %v829_v6  ;;  %767 = vmatmul.msk.bf16.vlgmr.msrb.gmra.mxu3 %vm274_vm0, %v831_v7 }
  0x87   : > { %486 = vmatpush.bf16.msra.mxu3 %v474_v3 }
  0x8a   : > { %v324_v11 = vpop.permute.xlu0 %323  ;;  %v384_v13 = vpop.permute.xlu1 %383 }
  0x8b   : > { %336 = vmatpush.bf16.msra.mxu2 %v324_v11  ;;  %396 = vmatpush.bf16.msrb.mxu0 %v384_v13  ;;  %v838_v11 = vld [vmem:[%s1042_s4 + $0x8] sm:$0xff] }
  0x8e   : > { %760 = vmatmul.msk.bf16.vlgmr.msra.gmra.mxu2 %vm274_vm0, %v830_v12  ;;  %v840_v12 = vld [vmem:[%s1042_s4 + $0x18] sm:$0xff] }
  0x8f   : > { %456 = vmatpush.bf16.msrb.mxu2 %v444_v2 }
  0x92   : > { %v414_v17 = vpop.permute.xlu0 %413  ;;  %v504_v19 = vpop.permute.xlu1 %503 }
  0x93   : > { %426 = vmatpush.bf16.msra.mxu1 %v414_v17  ;;  %516 = vmatpush.bf16.msra.mxu0 %v504_v19 }
  0x96   : > { %774 = vmatmul.msk.bf16.vlgmr.msrb.gmra.mxu0 %vm274_vm0, %v832_v16  ;;  %795 = vmatmul.msk.bf16.vlgmr.msra.gmra.mxu3 %vm274_vm0, %v835_v18  ;;  %v572_v16 = vpop.permute.xlu2 %571 }
  0x97   : > { %781 = vmatmul.msk.bf16.vlgmr.msra.gmra.mxu1 %vm274_vm0, %v833_v20  ;;  %v310_v26 = vpop.f32.mrf.mxu3 }
  0x9a   : > { %v535_v1 = vpop.permute.xlu0 %534  ;;  %v567_v13 = vpop.permute.xlu1 %566 }
  0x9e   : > { %788 = vmatmul.msk.bf16.vlgmr.msrb.gmra.mxu2 %vm274_vm0, %v834_v23  ;;  %v582_v23 = vpop.permute.xlu2 %581 }
  0x9f   : > { %v312_v28 = vpop.f32.mrf.mxu3 }
  0xa2   : > { %v577_v17 = vpop.permute.xlu1 %576  ;;  %v587_v18 = vpop.permute.xlu0 %586 }
  0xa6   : > { %802 = vmatmul.msk.bf16.vlgmr.msra.gmra.mxu0 %vm274_vm0, %v836_v25 }
  0xf6   : > { %v592_v24 = vpop.permute.xlu1 %591 }
 0x103   : > { %v287_v27 = vpop.f32.mrf.mxu0 }
 0x104   : > { %v311_v32 = vadd.f32 %v310_v26, %v287_v27 }
 0x109   : > { %v368_v30 = vpop.f32.mrf.mxu3 }
 0x10b   : > { %v289_v29 = vpop.f32.mrf.mxu0 }
 0x10c   : > { %v313_v38 = vadd.f32 %v312_v28, %v289_v29  ;;  %v597_v29 = vpop.permute.xlu2 %596 }
 0x111   : > { %v338_v31 = vpop.f32.mrf.mxu2  ;;  %v370_v35 = vpop.f32.mrf.mxu3 }
 0x112   : > { %v343_v34 = vadd.f32 %v338_v31, %v311_v32 }
 0x113   : > { %v398_v33 = vpop.f32.mrf.mxu0 }
 0x114   : > { %v373_v36 = vadd.f32 %v368_v30, %v343_v34  ;;  %v428_v40 = vpop.f32.mrf.mxu1  ;;  %v602_v34 = vpop.permute.xlu0 %601 }
 0x116   : > { %v403_v42 = vadd.f32 %v398_v33, %v373_v36 }
 0x118   : > { %v433_v44 = vadd.f32 %v428_v40, %v403_v42 }
 0x119   : > { %v340_v37 = vpop.f32.mrf.mxu2  ;;  %v488_v46 = vpop.f32.mrf.mxu3 }
 0x11a   : > { %v344_v43 = vadd.f32 %v340_v37, %v313_v38 }
 0x11b   : > { %v400_v41 = vpop.f32.mrf.mxu0 }
 0x11c   : > { %v374_v45 = vadd.f32 %v370_v35, %v344_v43  ;;  %v430_v52 = vpop.f32.mrf.mxu1 }
 0x11e   : > { %v404_v50 = vadd.f32 %v400_v41, %v374_v45 }
 0x120   : > { %v434_v53 = vadd.f32 %v430_v52, %v404_v50 }
 0x121   : > { %v458_v47 = vpop.f32.mrf.mxu2  ;;  %v490_v59 = vpop.f32.mrf.mxu3 }
 0x122   : > { %v463_v48 = vadd.f32 %v458_v47, %v433_v44 }
 0x123   : > { %v518_v49 = vpop.f32.mrf.mxu0 }
 0x124   : > { %v493_v51 = vadd.f32 %v488_v46, %v463_v48 }
 0x126   : > { %v523_v54 = vadd.f32 %v518_v49, %v493_v51 }
 0x128   : > { %v537_v60 = vadd.f32 %v530_v58, %v523_v54 }
 0x129   : > { %v460_v55 = vpop.f32.mrf.mxu2 }
 0x12a   : > { %v464_v56 = vadd.f32 %v460_v55, %v434_v53  ;;  %v543_v3 = vmul.f32 %v542_v63, %v537_v60  ;;  %vm540_vm1 = vcmp.ge.f32.partialorder %v537_v60, 0.0 }
 0x12b   : > { %v520_v62 = vpop.f32.mrf.mxu0 }
 0x12c   : > { %v494_v61 = vadd.f32 %v490_v59, %v464_v56  ;;  %v545_v6 = vsel %vm540_vm1, %v537_v60, %v543_v3 }
 0x12e   : > { %v524_v0 = vadd.f32 %v520_v62, %v494_v61 }
 0x130   : > { %v538_v2 = vadd.f32 %v535_v1, %v524_v0 }
 0x132   : > { %vm541_vm2 = vcmp.ge.f32.partialorder %v538_v2, 0.0  ;;  %v544_v5 = vmul.f32 %v542_v63, %v538_v2 }
 0x134   : > { %v546_v7 = vsel %vm541_vm2, %v538_v2, %v544_v5 }
 0x135   : > { %v555_v8 = vpack.c.bf16 %v546_v7, %v545_v6 }
 0x137   : > { %643 = vmatpush.bf16.msrb.mxu1 %v555_v8  ;;  %841 = vmatpush.bf16.msra.mxu2 %v555_v8 }
 0x13a   : > { %819 = vmatmul.msk.bf16.vlgmr.msrb.gmra.mxu1 %vm274_vm0, %v837_v9  ;;  %821 = vmatmul.msk.bf16.vlgmr.msra.gmra.mxu2 %vm274_vm0, %v839_v10 }
 0x14a   : > { %820 = vmatmul.msk.bf16.gmra.mxu1 %vm274_vm0, %v838_v11  ;;  %822 = vmatmul.msk.bf16.gmra.mxu2 %vm274_vm0, %v840_v12 }
 0x1b7   : > { %v645_v14 = vpop.f32.mrf.mxu1 }
 0x1b8   : > { %v646_v15 = vadd.f32 %v645_v14, %v567_v13 }
 0x1ba   : > { %666 = vst.msk [vmem:[%s1017_s16] sm:$0xff] %vm665_vm3, %v646_v15 }
 0x1bd   : > { %v655_v19 = vpop.f32.mrf.mxu2 }
 0x1be   : > { %v656_v20 = vadd.f32 %v655_v19, %v587_v18 }
 0x1bf   : > { %v647_v21 = vpop.f32.mrf.mxu1 }
 0x1c0   : > { %670 = vst.msk [vmem:[%s1017_s16 + $0x20] sm:$0xff] %vm665_vm3, %v656_v20  ;;  %v648_v22 = vadd.f32 %v647_v21, %v572_v16 }
 0x1c2   : > { %667 = vst.msk [vmem:[%s1017_s16 + $0x8] sm:$0xff] %vm665_vm3, %v648_v22 }
 0x1c5   : > { %v657_v25 = vpop.f32.mrf.mxu2 }
 0x1c6   : > { %v658_v26 = vadd.f32 %v657_v25, %v592_v24 }
 0x1c7   : > { %v650_v27 = vpop.f32.mrf.mxu1 }
 0x1c8   : > { %v651_v28 = vadd.f32 %v650_v27, %v577_v17  ;;  %671 = vst.msk [vmem:[%s1017_s16 + $0x28] sm:$0xff] %vm665_vm3, %v658_v26 }
 0x1ca   : > { %668 = vst.msk [vmem:[%s1017_s16 + $0x10] sm:$0xff] %vm665_vm3, %v651_v28 }
 0x1cd   : > { %v660_v30 = vpop.f32.mrf.mxu2 }
 0x1ce   : > { %v661_v31 = vadd.f32 %v660_v30, %v597_v29 }
 0x1cf   : > { %v652_v32 = vpop.f32.mrf.mxu1 }
 0x1d0   : > { %672 = vst.msk [vmem:[%s1017_s16 + $0x30] sm:$0xff] %vm665_vm3, %v661_v31  ;;  %v653_v33 = vadd.f32 %v652_v32, %v582_v23 }
 0x1d2   : > { %669 = vst.msk [vmem:[%s1017_s16 + $0x18] sm:$0xff] %vm665_vm3, %v653_v33 }
 0x1d5   : > { %v662_v35 = vpop.f32.mrf.mxu2 }
 0x1d6   : > { %v663_v36 = vadd.f32 %v662_v35, %v602_v34 }
 0x1d8   : > { %673 = vst.msk [vmem:[%s1017_s16 + $0x38] sm:$0xff] %vm665_vm3, %v663_v36 }
 0x1d9 PF: > { %s17_s23 = sadd.s32 1, %s868_s23  }
 0x1da   : > { %p14_p4 = scmp.ge.s32.totalorder %s17_s23, 4  }
 0x1dc   :  { %16 = sbr.rel (!%p14_p4) target bundleno = 2 (0x2), region = 82 }

</bundles_post_ra>
